<compile_context>
chip_gen: v6e
topology: v6e:2x2x1
jax: 0.10.0
libtpu: 0.0.40
codegen_flags: <defaults>
</compile_context>

<pallas_src>
import jax
import jax.numpy as jnp
from jax.experimental import pallas as pl
from jax.experimental.pallas import tpu as pltpu


def _posenc_kernel(x_ref, p_ref, o_ref):
    """One grid step == one T-tile across the whole batch.

    x_ref: (B, tile_t, H) VMEM
    p_ref: (tile_t, H)    VMEM   (broadcast over batch)
    o_ref: (B, tile_t, H) VMEM
    """
    # Native-dtype add; (tile_t, H) broadcasts over the leading batch dim.
    o_ref[...] = x_ref[...] + p_ref[...]


def make_positional_table(max_len, num_hiddens, dtype=jnp.float32):
    """Builds the (max_len, num_hiddens) sin/cos table (module __init__)."""
    pos = jnp.arange(max_len, dtype=jnp.float32)[:, None]
    exponents = jnp.arange(0, num_hiddens, 2, dtype=jnp.float32) / num_hiddens
    angles = pos / jnp.power(jnp.float32(10000.0), exponents)  # (max_len, ceil(H/2))
    table = jnp.zeros((max_len, num_hiddens), jnp.float32)
    table = table.at[:, 0::2].set(jnp.sin(angles))
    table = table.at[:, 1::2].set(jnp.cos(angles[:, : num_hiddens // 2]))
    return table.astype(dtype)


def _choose_tile_t(B, T, H, itemsize, budget_bytes=2 << 20):
    """Largest multiple-of-8 T-tile keeping the x block ≲ budget per buffer."""
    if T <= 8:
        return T
    per_row = max(1, B * H * itemsize)
    t = min(T, max(8, budget_bytes // per_row))
    t = max(8, (t // 8) * 8)
    return min(t, T)


def positional_encoding(x, p_table):
    """Pallas implementation of PositionalEncoding.forward (eval mode).

    x:        (B, T, H)
    p_table:  (max_len, H), max_len >= T
    returns   (B, T, H) = x + p_table[:T]  (dropout is identity in eval)
    """
    B, T, H = x.shape
    assert p_table.shape[1] == H and p_table.shape[0] >= T

    # Slice + cast once in the wrapper so the kernel does zero dtype juggling.
    p = p_table[:T].astype(x.dtype)  # (T, H)

    tile_t = _choose_tile_t(B, T, H, x.dtype.itemsize)
    grid = (pl.cdiv(T, tile_t),)

    return pl.pallas_call(
        _posenc_kernel,
        out_shape=jax.ShapeDtypeStruct((B, T, H), x.dtype),
        grid=grid,
        in_specs=[
            pl.BlockSpec((B, tile_t, H), lambda t: (0, t, 0)),  # x tile
            pl.BlockSpec((tile_t, H), lambda t: (t, 0)),        # P tile (2-D)
        ],
        out_specs=pl.BlockSpec((B, tile_t, H), lambda t: (0, t, 0)),
        compiler_params=pltpu.CompilerParams(
            dimension_semantics=("parallel",),
            vmem_limit_bytes=32 * 1024 * 1024,
        ),
    )(x, p)


def _reference(x, p_table):
    """Pure-JAX reference mirroring the PyTorch forward (eval mode)."""
    T = x.shape[1]
    return x + p_table[None, :T, :].astype(x.dtype)


if __name__ == "__main__":
    key = jax.random.PRNGKey(0)

    B, T, H = 2, 8, 32          # batch=2, seq=8, hidden=32
    max_len = 1000

    x = jax.random.normal(key, (B, T, H), dtype=jnp.float32)
    p_table = make_positional_table(max_len, H, dtype=jnp.float32)

    out = positional_encoding(x, p_table)
    out = jax.block_until_ready(out)

    ref = _reference(x, p_table)
    assert out.shape == (B, T, H)
    assert jnp.allclose(out, ref, atol=1e-6, rtol=1e-6)

    print("KERNEL_OK")
</pallas_src>

<mosaic_0001>
module attributes {stable_mosaic.version = 11 : i64} {
  func.func @_posenc_kernel(%arg0: i32, %arg1: memref<2x8x32xf32, #tpu.memory_space<vmem>>, %arg2: memref<8x32xf32, #tpu.memory_space<vmem>>, %arg3: memref<2x8x32xf32, #tpu.memory_space<vmem>>) attributes {dimension_semantics = [#tpu.dimension_semantics<parallel>], iteration_bounds = array<i64: 1>, scalar_prefetch = 0 : i64, scratch_operands = 0 : i64, tpu.core_type = #tpu.core_type<tc>, window_params = [{transform_indices = @transform_0, window_bounds = array<i64: 2, 8, 32>}, {transform_indices = @transform_1, window_bounds = array<i64: 8, 32>}, {transform_indices = @transform_2, window_bounds = array<i64: 2, 8, 32>}]} {
    %c0 = arith.constant 0 : index
    %c0_0 = arith.constant 0 : index
    %c0_1 = arith.constant 0 : index
    %0 = vector.load %arg1[%c0, %c0_0, %c0_1] : memref<2x8x32xf32, #tpu.memory_space<vmem>>, vector<2x8x32xf32>
    %c0_2 = arith.constant 0 : index
    %c0_3 = arith.constant 0 : index
    %1 = vector.load %arg2[%c0_2, %c0_3] : memref<8x32xf32, #tpu.memory_space<vmem>>, vector<8x32xf32>
    %2 = vector.shape_cast %1 : vector<8x32xf32> to vector<1x8x32xf32>
    %3 = vector.broadcast %2 : vector<1x8x32xf32> to vector<2x8x32xf32>
    %4 = arith.addf %0, %3 : vector<2x8x32xf32>
    %c0_4 = arith.constant 0 : index
    %c0_5 = arith.constant 0 : index
    %c0_6 = arith.constant 0 : index
    %5 = vector.load %arg3[%c0_4, %c0_5, %c0_6] : memref<2x8x32xf32, #tpu.memory_space<vmem>>, vector<2x8x32xf32>
    tpu.vector_store %arg3[%c0_4, %c0_5, %c0_6], %4 {strides = array<i32>} : memref<2x8x32xf32, #tpu.memory_space<vmem>>, vector<2x8x32xf32>,
    return
  }
  func.func @transform_0(%arg0: i32) -> (i32, i32, i32) {
    %c0_i32 = arith.constant 0 : i32
    %c0_i32_0 = arith.constant 0 : i32
    %c0_i32_1 = arith.constant 0 : i32
    return %c0_i32, %arg0, %c0_i32_0 : i32, i32, i32
  }
  func.func @transform_1(%arg0: i32) -> (i32, i32) {
    %c0_i32 = arith.constant 0 : i32
    %c0_i32_0 = arith.constant 0 : i32
    return %arg0, %c0_i32 : i32, i32
  }
  func.func @transform_2(%arg0: i32) -> (i32, i32, i32) {
    %c0_i32 = arith.constant 0 : i32
    %c0_i32_0 = arith.constant 0 : i32
    %c0_i32_1 = arith.constant 0 : i32
    return %c0_i32, %arg0, %c0_i32_0 : i32, i32, i32
  }
}

</mosaic_0001>

<bundles_post_ra>
// kernel: tpu_custom_call.1
= control target key start
LH: loop header
LB: loop body
LE: loop exit
PB: predicated region body
PF: predicated region fallthrough
CT: control target
= control target key end

     0   :  { %7 = vsyncpa [#allocation3], 0  ;;  %s170_s0 = inlined_call_operand.hbm [shape: f32[2,8,32], index: 0, kind: input, shape index: {}]   ;;  %s171_s1 = inlined_call_operand.hbm [shape: f32[8,32], index: 1, kind: input, shape index: {}]   ;;  %s172_s2 = inlined_call_operand.hbm [shape: f32[2,8,32], index: 2, kind: output, shape index: {}]  }
   0x1   :  { %8 = vsyncpa [#allocation6], 0 }
   0x2   :  { %9 = vsyncpa [#allocation4], 0  ;;  %s135_s9 = smov [#allocation2]  }
   0x3   :  { %s15_s10 = sshll.u32 %s135_s9, 4  ;;  %s16_s10 = int_to_ptr.vmem [resolvable:$true] %s15_s10 }
   0x4   :  { %s77_s11 = scalar_lea.vmem %s16_s10, 256  ;;  %p82_p1 = scmp.lt.s32.totalorder %s16_s10, %s16_s10 }
   0x5   :  { %p78_p0 = scmp.ne.s32.totalorder %s16_s10, %s77_s11  ;;  %p83_p2 = scmp.lt.s32.totalorder %s77_s11, %s77_s11 }
   0x7   :  { %p84_p3 = por %p83_p2, %p82_p1 }
   0x9   :  { %p85_p4 = pnand %p84_p3, %p78_p0 }
   0xb   :  { %88 = shalt.err (!%p85_p4)
}
   0xc   :  { %s136_s12 = smov 128   ;;  %s137_s13 = smov 8  }
   0xd   :  { %21 = dma.hbm_to_vmem [thread:$0]  %s170_s0, 256, %s16_s10, [#allocation3], %s136_s12, %s136_s12, %s137_s13  }
   0xe   :  { %s138_s16 = smov [#allocation5]  }
   0xf   :  { %s28_s17 = sshll.u32 %s138_s16, 4  ;;  %s29_s17 = int_to_ptr.vmem [resolvable:$true] %s28_s17 }
  0x10   :  { %s97_s18 = scalar_lea.vmem %s29_s17, 128  ;;  %p102_p6 = scmp.lt.s32.totalorder %s29_s17, %s29_s17 }
  0x11   :  { %p98_p5 = scmp.ne.s32.totalorder %s29_s17, %s97_s18  ;;  %p103_p7 = scmp.lt.s32.totalorder %s97_s18, %s97_s18 }
  0x13   :  { %p104_p8 = por %p103_p7, %p102_p6 }
  0x15   :  { %p105_p9 = pnand %p104_p8, %p98_p5 }
  0x17   :  { %108 = shalt.err (!%p105_p9)
}
  0x18   :  { %31 = dma.hbm_to_vmem [thread:$0]  %s171_s1, 128, %s29_s17, [#allocation6]  }
  0x19   :  { %129 = dma.done.wait [#allocation3], 256  }
  0x1a   :  { %130 = vsyncadd [#allocation3], 4294967040 }
  0x1b   :  { %131 = dma.done.wait [#allocation6], 128  }
  0x1c   :  { %132 = vsyncadd [#allocation6], 4294967168  ;;  %s139_s21 = smov [#allocation7]   ;;  %v38_v0 = vld [vmem:[#allocation2] sm:$0xff]  ;;  %v40_v1 = vld [vmem:[#allocation5] sm:$0xff]  ;;  %vm43_vm0 = vcmask 261120  }
  0x1d   :  { %s51_s0 = sshll.u32 %s139_s21, 4  ;;  %v39_v2 = vld [vmem:[#allocation2 + $0x8] sm:$0xff]  ;;  %v41_v3 = vadd.f32 %v40_v1, %v38_v0  ;;  %s52_s0 = int_to_ptr.vmem [resolvable:$true] %s51_s0 }
  0x1e   :  { %v42_v4 = vadd.f32 %v40_v1, %v39_v2  ;;  %s109_s22 = scalar_lea.vmem %s52_s0, 256  ;;  %p114_p11 = scmp.lt.s32.totalorder %s52_s0, %s52_s0 }
  0x1f   :  { %44 = vst.msk [vmem:[#allocation7] sm:$0xff] %vm43_vm0, %v41_v3  ;;  %p110_p10 = scmp.ne.s32.totalorder %s52_s0, %s109_s22  ;;  %p115_p12 = scmp.lt.s32.totalorder %s109_s22, %s109_s22 }
  0x20   :  { %45 = vst.msk [vmem:[#allocation7 + $0x8] sm:$0xff] %vm43_vm0, %v42_v4 }
  0x21   :  { %p116_p13 = por %p115_p12, %p114_p11 }
  0x23   :  { %p117_p0 = pnand %p116_p13, %p110_p10 }
  0x25   :  { %120 = shalt.err (!%p117_p0)
}
  0x26   :  { %57 = dma.vmem_to_hbm [thread:$0]  %s52_s0, 256, %s172_s2, [#allocation4], %s136_s12, %s136_s12, %s137_s13  }
  0x27   :  { %133 = dma.done.wait [#allocation4], 256  }
  0x28   :  { %134 = vsyncadd [#allocation4], 4294967040 }
  0x29   :  { %61 = vsyncpa [#allocation3], 1 }
  0x2a   :  { %62 = vsyncpa [#allocation6], 1 }
  0x2b   :  { %63 = vsyncpa [#allocation4], 1 }

</bundles_post_ra>
